<compile_context>
chip_gen: v7x
topology: tpu7x:2x2x1
jax: 0.10.0
libtpu: 0.0.40
codegen_flags: <defaults>
</compile_context>

<pallas_src>
from functools import partial

import numpy as np
import jax
import jax.numpy as jnp
from jax import lax
from jax.experimental import pallas as pl
from jax.experimental.pallas import tpu as pltpu


def _round_up(x, m):
    return (x + m - 1) // m * m


def build_tables(top_index, down_index, n_nodes, feats, m_pad):
    """Compact index/weight representation of the forward's re-indexing.

    Torch forward (per batch, channels-last xp = x.T of shape [N, C]):
        x7[j, c]     = xp[j // 7, c]
        out[i, c]    = x7[top[i], c]                                  (i < N)
        out[N+m', c] = 0.5 * sum_{p in 0,1} x7[down[2m' + (2c+p)//C], (2c+p)%C]
    The down term factors into two node gathers (rows 2m' / 2m'+1 of `down`)
    preceded by data-independent [C, C] channel mixes W0 / W1 (mix and gather
    commute since they act on different axes).
    """
    N, C = n_nodes, feats
    M = 4 * N - 6
    top = np.asarray(top_index, dtype=np.int64)
    down = np.asarray(down_index, dtype=np.int64)
    assert top.shape == (N,) and down.shape == (2 * (M - N),)

    # Packed source-node ids per output vertex; -1 means "no contribution".
    # Row 0: top source (cols < N).  Rows 1/2: down pair sources (cols >= N).
    idx = np.full((3, m_pad), -1, np.int32)
    idx[0, :N] = top // 7
    idx[1, N:M] = down[0::2] // 7
    idx[2, N:M] = down[1::2] // 7

    # Channel-pair mixing reproducing torch's .view(B, -1, C, 2).mean(3) interleave.
    W0 = np.zeros((C, C), np.float32)
    W1 = np.zeros((C, C), np.float32)
    for c in range(C):
        for p in (0, 1):
            e = 2 * c + p
            (W0 if e < C else W1)[c, e % C] += 0.5

    return idx, W0, W1


def _upsample_gather_kernel(idx_ref, s_ref, o_ref, *, n_top):
    # idx_ref: [3, TN] int32 packed source-node ids for this output slab (-1 = none)
    # s_ref:   [3, BCp, CH] f32 stacked sources (x, W0@x, W1@x) for this node chunk
    # o_ref:   [BCp, TN] f32 lane-dense output slab (VMEM-resident across node chunks)
    j = pl.program_id(0)            # output-column tile
    k = pl.program_id(1)            # node chunk (reduction axis, last in grid)
    tn = o_ref.shape[1]
    ch = s_ref.shape[2]

    @pl.when(k == 0)
    def _init():
        o_ref[...] = jnp.zeros_like(o_ref)

    col0 = j * tn
    node0 = k * ch
    # Shift indices into chunk-local coordinates; -1 / out-of-chunk never match.
    idx = idx_ref[...] - node0                                     # [3, TN]

    # Single hoisted iota per step; each active source adds one compare+convert
    # and one MXU matmul (gather-as-one-hot-matmul, no per-lane dynamic gather).
    rows = lax.broadcasted_iota(jnp.int32, (ch, tn), 0)            # [CH, TN]

    @pl.when(col0 < n_top)                 # tile touches the "top" region
    def _top():
        oh = (rows == idx[0:1, :]).astype(jnp.float32)             # [CH, TN]
        o_ref[...] += jnp.dot(s_ref[0], oh, preferred_element_type=jnp.float32)

    @pl.when(col0 + tn > n_top)            # tile touches the "down" region
    def _down():
        oh0 = (rows == idx[1:2, :]).astype(jnp.float32)
        oh1 = (rows == idx[2:3, :]).astype(jnp.float32)
        o_ref[...] += (jnp.dot(s_ref[1], oh0, preferred_element_type=jnp.float32)
                       + jnp.dot(s_ref[2], oh1, preferred_element_type=jnp.float32))


def up_layer_norm_forward(x, top_index, down_index, *, tile_n=512, node_chunk=1024):
    """x: [B, C, N] float32 (channels-first, like torch). Returns [B, C, 4N-6]."""
    B, C, N = x.shape
    M = 4 * N - 6
    BC = B * C
    BCp = _round_up(BC, 8)

    tile_n = _round_up(int(tile_n), 128)
    node_chunk = _round_up(int(node_chunk), 128)

    # Node (contraction) axis: chunked so the in-register one-hot stays bounded.
    Np = _round_up(N, 128)
    CH = min(node_chunk, Np)
    Npp = _round_up(Np, CH)

    # Output (lane) axis: keep >=2 tiles when possible so the "parallel" axis can
    # be sharded across both v7x TensorCores (on 1-TC chips it's just 2 cheap steps).
    Mp = _round_up(M, 128)
    if Mp <= tile_n:
        TN = 128 if Mp == 128 else _round_up((Mp + 1) // 2, 128)
    else:
        TN = tile_n
    Mp = _round_up(Mp, TN)

    idx, W0, W1 = build_tables(top_index, down_index, N, C, Mp)

    # Pre-apply the tiny [C, C] channel mixes once (removes 2 of the former 5
    # per-tile matmuls); stack sources and flatten channels-first (no transposes).
    x = x.astype(jnp.float32)
    xw0 = jnp.einsum('oc,bcn->bon', jnp.asarray(W0), x)
    xw1 = jnp.einsum('oc,bcn->bon', jnp.asarray(W1), x)
    src = jnp.stack([x, xw0, xw1], axis=0).reshape(3, BC, N)
    src = jnp.pad(src, ((0, 0), (0, BCp - BC), (0, Npp - N)))      # [3, BCp, Npp]

    # VMEM budget from the actual footprint (double-buffered blocks + live temps).
    vmem_bytes = (2 * 3 * BCp * CH * 4      # stacked source block
                  + 2 * 3 * TN * 4          # packed index block
                  + 2 * BCp * TN * 4        # output block
                  + 3 * CH * TN * 4)        # iota + up to two live one-hot tiles
    vmem_limit = min(max(2 * vmem_bytes, 8 << 20), 64 << 20)
    # NOTE: the source/index blocks have (partially) constant index maps; once
    # pl.Buffered(1) is universally available it would halve their VMEM share.

    flops = 2 * BCp * Npp * (min(N, Mp) + 2 * max(Mp - N, 0))
    bytes_accessed = 4 * (3 * BCp * Npp + 3 * Mp + BCp * Mp)

    y_pad = pl.pallas_call(
        partial(_upsample_gather_kernel, n_top=N),
        out_shape=jax.ShapeDtypeStruct((BCp, Mp), jnp.float32),
        grid_spec=pltpu.PrefetchScalarGridSpec(
            num_scalar_prefetch=0,
            grid=(Mp // TN, Npp // CH),
            in_specs=[
                pl.BlockSpec((3, TN), lambda j, k: (0, j)),         # packed indices
                pl.BlockSpec((3, BCp, CH), lambda j, k: (0, 0, k)),  # stacked sources
            ],
            out_specs=pl.BlockSpec((BCp, TN), lambda j, k: (0, j)),
        ),
        compiler_params=pltpu.CompilerParams(
            dimension_semantics=("parallel", "arbitrary"),
            vmem_limit_bytes=int(vmem_limit),
        ),
        cost_estimate=pl.CostEstimate(
            flops=int(flops), transcendentals=0, bytes_accessed=int(bytes_accessed)),
    )(jnp.asarray(idx), src)

    return y_pad[:BC, :M].reshape(B, C, M)


def reference_forward(x, top_index, down_index, out_feats):
    """Pure-JAX transliteration of the torch forward (for validation)."""
    B, C, N = x.shape
    xp = jnp.transpose(x, (0, 2, 1))
    x7 = jnp.concatenate([xp] * 7, axis=2).reshape(B, N * 7, out_feats)
    x1 = x7[:, top_index, :]
    x2 = x7[:, down_index, :].reshape(B, -1, out_feats, 2)
    out = jnp.concatenate([x1, jnp.mean(x2, axis=3)], axis=1)
    return jnp.transpose(out, (0, 2, 1))


if __name__ == "__main__":
    # Small icosahedron-like sizes: level-1 sphere has 42 vertices -> 4*42-6 = 162.
    B, C, N = 2, 8, 42           # batch, in_feats == out_feats, vertices
    M = 4 * N - 6

    key = jax.random.PRNGKey(0)
    k_top, k_down, k_x = jax.random.split(key, 3)
    # Synthetic (deterministic) upsampling index tables; valid range is [0, 7*N).
    top_index = np.asarray(jax.random.randint(k_top, (N,), 0, 7 * N, dtype=jnp.int32))
    down_index = np.asarray(
        jax.random.randint(k_down, (2 * (M - N),), 0, 7 * N, dtype=jnp.int32))
    x = jax.random.normal(k_x, (B, C, N), dtype=jnp.float32)

    y = up_layer_norm_forward(x, top_index, down_index)
    y = jax.block_until_ready(y)
    assert y.shape == (B, C, M)

    y_ref = reference_forward(x, jnp.asarray(top_index), jnp.asarray(down_index), C)
    np.testing.assert_allclose(np.asarray(y), np.asarray(y_ref), rtol=1e-4, atol=1e-4)

    print("KERNEL_OK")
</pallas_src>

<mosaic_0001>
module attributes {stable_mosaic.version = 11 : i64} {
  func.func @_upsample_gather_kernel(%arg0: i32, %arg1: i32, %arg2: memref<3x128xi32, #tpu.memory_space<vmem>>, %arg3: memref<3x16x128xf32, #tpu.memory_space<vmem>>, %arg4: memref<16x128xf32, #tpu.memory_space<vmem>>) attributes {dimension_semantics = [#tpu.dimension_semantics<parallel>, #tpu.dimension_semantics<arbitrary>], iteration_bounds = array<i64: 2, 1>, scalar_prefetch = 0 : i64, scratch_operands = 0 : i64, tpu.core_type = #tpu.core_type<tc>, window_params = [{transform_indices = @transform_0, window_bounds = array<i64: 3, 128>}, {transform_indices = @transform_1, window_bounds = array<i64: 3, 16, 128>}, {transform_indices = @transform_2, window_bounds = array<i64: 16, 128>}]} {
    %c0_i32 = arith.constant 0 : i32
    %0 = arith.cmpi eq, %arg1, %c0_i32 : i32
    %1 = arith.extui %0 : i1 to i32
    %c0_i32_0 = arith.constant 0 : i32
    %2 = arith.cmpi ne, %1, %c0_i32_0 : i32
    scf.if %2 {
      %cst = arith.constant 0.000000e+00 : f32
      %16 = vector.broadcast %cst : f32 to vector<16x128xf32>
      %c0_7 = arith.constant 0 : index
      %c0_8 = arith.constant 0 : index
      %17 = vector.load %arg4[%c0_7, %c0_8] : memref<16x128xf32, #tpu.memory_space<vmem>>, vector<16x128xf32>
      tpu.vector_store %arg4[%c0_7, %c0_8], %16 {strides = array<i32>} : memref<16x128xf32, #tpu.memory_space<vmem>>, vector<16x128xf32>,
    } else {
    }
    %c128_i32 = arith.constant 128 : i32
    %3 = arith.muli %arg0, %c128_i32 : i32
    %c128_i32_1 = arith.constant 128 : i32
    %4 = arith.muli %arg1, %c128_i32_1 : i32
    %c0 = arith.constant 0 : index
    %c0_2 = arith.constant 0 : index
    %5 = vector.load %arg2[%c0, %c0_2] : memref<3x128xi32, #tpu.memory_space<vmem>>, vector<3x128xi32>
    %6 = vector.broadcast %4 : i32 to vector<3x128xi32>
    %7 = arith.subi %5, %6 : vector<3x128xi32>
    %8 = tpu.iota {dimensions = array<i32: 0>} : vector<128x128xi32>
    %c42_i32 = arith.constant 42 : i32
    %9 = arith.cmpi slt, %3, %c42_i32 : i32
    %10 = arith.extui %9 : i1 to i32
    %c0_i32_3 = arith.constant 0 : i32
    %11 = arith.cmpi ne, %10, %c0_i32_3 : i32
    scf.if %11 {
      %16 = vector.extract_strided_slice %7 {offsets = [0, 0], sizes = [1, 128], strides = [1, 1]} : vector<3x128xi32> to vector<1x128xi32>
      %17 = vector.broadcast %16 : vector<1x128xi32> to vector<128x128xi32>
      %18 = arith.cmpi eq, %8, %17 : vector<128x128xi32>
      %19 = arith.extui %18 : vector<128x128xi1> to vector<128x128xi32>
      %20 = arith.sitofp %19 : vector<128x128xi32> to vector<128x128xf32>
      %c0_7 = arith.constant 0 : index
      %c0_8 = arith.constant 0 : index
      %21 = vector.load %arg4[%c0_7, %c0_8] : memref<16x128xf32, #tpu.memory_space<vmem>>, vector<16x128xf32>
      %c0_9 = arith.constant 0 : index
      %c0_10 = arith.constant 0 : index
      %c0_11 = arith.constant 0 : index
      %22 = vector.load %arg3[%c0_9, %c0_10, %c0_11] : memref<3x16x128xf32, #tpu.memory_space<vmem>>, vector<1x16x128xf32>
      %23 = vector.shape_cast %22 : vector<1x16x128xf32> to vector<16x128xf32>
      %cst = arith.constant dense<0.000000e+00> : vector<16x128xf32>
      %24 = tpu.matmul %23, %20, %cst {dimension_numbers = #tpu.dot_dimension_numbers<[1], [0], [0], [1], [0, 0, 1, 1], [], []>} : vector<16x128xf32>, vector<128x128xf32>, vector<16x128xf32> -> vector<16x128xf32>
      %25 = arith.addf %21, %24 : vector<16x128xf32>
      %c0_12 = arith.constant 0 : index
      %c0_13 = arith.constant 0 : index
      %26 = vector.load %arg4[%c0_12, %c0_13] : memref<16x128xf32, #tpu.memory_space<vmem>>, vector<16x128xf32>
      tpu.vector_store %arg4[%c0_12, %c0_13], %25 {strides = array<i32>} : memref<16x128xf32, #tpu.memory_space<vmem>>, vector<16x128xf32>,
    } else {
    }
    %c128_i32_4 = arith.constant 128 : i32
    %12 = arith.addi %3, %c128_i32_4 : i32
    %c42_i32_5 = arith.constant 42 : i32
    %13 = arith.cmpi sgt, %12, %c42_i32_5 : i32
    %14 = arith.extui %13 : i1 to i32
    %c0_i32_6 = arith.constant 0 : i32
    %15 = arith.cmpi ne, %14, %c0_i32_6 : i32
    scf.if %15 {
      %16 = vector.extract_strided_slice %7 {offsets = [1, 0], sizes = [1, 128], strides = [1, 1]} : vector<3x128xi32> to vector<1x128xi32>
      %17 = vector.broadcast %16 : vector<1x128xi32> to vector<128x128xi32>
      %18 = arith.cmpi eq, %8, %17 : vector<128x128xi32>
      %19 = arith.extui %18 : vector<128x128xi1> to vector<128x128xi32>
      %20 = arith.sitofp %19 : vector<128x128xi32> to vector<128x128xf32>
      %21 = vector.extract_strided_slice %7 {offsets = [2, 0], sizes = [1, 128], strides = [1, 1]} : vector<3x128xi32> to vector<1x128xi32>
      %22 = vector.broadcast %21 : vector<1x128xi32> to vector<128x128xi32>
      %23 = arith.cmpi eq, %8, %22 : vector<128x128xi32>
      %24 = arith.extui %23 : vector<128x128xi1> to vector<128x128xi32>
      %25 = arith.sitofp %24 : vector<128x128xi32> to vector<128x128xf32>
      %c0_7 = arith.constant 0 : index
      %c0_8 = arith.constant 0 : index
      %26 = vector.load %arg4[%c0_7, %c0_8] : memref<16x128xf32, #tpu.memory_space<vmem>>, vector<16x128xf32>
      %c1 = arith.constant 1 : index
      %c0_9 = arith.constant 0 : index
      %c0_10 = arith.constant 0 : index
      %27 = vector.load %arg3[%c1, %c0_9, %c0_10] : memref<3x16x128xf32, #tpu.memory_space<vmem>>, vector<1x16x128xf32>
      %28 = vector.shape_cast %27 : vector<1x16x128xf32> to vector<16x128xf32>
      %cst = arith.constant dense<0.000000e+00> : vector<16x128xf32>
      %29 = tpu.matmul %28, %20, %cst {dimension_numbers = #tpu.dot_dimension_numbers<[1], [0], [0], [1], [0, 0, 1, 1], [], []>} : vector<16x128xf32>, vector<128x128xf32>, vector<16x128xf32> -> vector<16x128xf32>
      %c2 = arith.constant 2 : index
      %c0_11 = arith.constant 0 : index
      %c0_12 = arith.constant 0 : index
      %30 = vector.load %arg3[%c2, %c0_11, %c0_12] : memref<3x16x128xf32, #tpu.memory_space<vmem>>, vector<1x16x128xf32>
      %31 = vector.shape_cast %30 : vector<1x16x128xf32> to vector<16x128xf32>
      %cst_13 = arith.constant dense<0.000000e+00> : vector<16x128xf32>
      %32 = tpu.matmul %31, %25, %cst_13 {dimension_numbers = #tpu.dot_dimension_numbers<[1], [0], [0], [1], [0, 0, 1, 1], [], []>} : vector<16x128xf32>, vector<128x128xf32>, vector<16x128xf32> -> vector<16x128xf32>
      %33 = arith.addf %29, %32 : vector<16x128xf32>
      %34 = arith.addf %26, %33 : vector<16x128xf32>
      %c0_14 = arith.constant 0 : index
      %c0_15 = arith.constant 0 : index
      %35 = vector.load %arg4[%c0_14, %c0_15] : memref<16x128xf32, #tpu.memory_space<vmem>>, vector<16x128xf32>
      tpu.vector_store %arg4[%c0_14, %c0_15], %34 {strides = array<i32>} : memref<16x128xf32, #tpu.memory_space<vmem>>, vector<16x128xf32>,
    } else {
    }
    return
  }
  func.func @transform_0(%arg0: i32, %arg1: i32) -> (i32, i32) {
    %c0_i32 = arith.constant 0 : i32
    %c0_i32_0 = arith.constant 0 : i32
    return %c0_i32, %arg0 : i32, i32
  }
  func.func @transform_1(%arg0: i32, %arg1: i32) -> (i32, i32, i32) {
    %c0_i32 = arith.constant 0 : i32
    %c0_i32_0 = arith.constant 0 : i32
    %c0_i32_1 = arith.constant 0 : i32
    return %c0_i32, %c0_i32_0, %arg1 : i32, i32, i32
  }
  func.func @transform_2(%arg0: i32, %arg1: i32) -> (i32, i32) {
    %c0_i32 = arith.constant 0 : i32
    %c0_i32_0 = arith.constant 0 : i32
    return %c0_i32, %arg0 : i32, i32
  }
}

</mosaic_0001>

<bundles_post_ra>
// kernel: tpu_custom_call.1
= control target key start
LH: loop header
LB: loop body
LE: loop exit
PB: predicated region body
PF: predicated region fallthrough
CT: control target
= control target key end

     0   :  { %7 = vsyncpa [#allocation3], 0  ;;  %s1799_s0 = inlined_call_operand.hbm [shape: s32[3,256], index: 0, kind: input, shape index: {}]   ;;  %s1800_s1 = inlined_call_operand.hbm [shape: f32[3,16,128], index: 1, kind: input, shape index: {}]   ;;  %s1801_s2 = inlined_call_operand.hbm [shape: f32[16,256], index: 2, kind: output, shape index: {}]  }
   0x1   :  { %9 = vsyncpa [#allocation3 + $0x1], 0 }
   0x2   :  { %10 = vsyncpa [#allocation6], 0 }
   0x3   :  { %11 = vsyncpa [#allocation4], 0 }
   0x4   :  { %13 = vsyncpa [#allocation4 + $0x1], 0  ;;  %s1361_s9 = smov 0   ;;  %s1363_s10 = smov 0  }
   0x5   :  { %s1365_s11 = smov 0   ;;  %s1367_s12 = smov 0  }
   0x6   :  { %s1369_s13 = smov 0   ;;  %s1371_s14 = smov 0  }
   0x7 LB: > { %s737_s15 = sadd.s32 4294967295, %s1333_s14   ;;  %s738_s16 = sadd.s32 4294967294, %s1333_s14   ;;  %s1333_s14 = sphi %s1371_s14, %s19_s14   ;;  %s1329_s13 = sphi %s1369_s13, %s1833_s13   ;;  %s1325_s12 = sphi %s1367_s12, %s1832_s12   ;;  %s1321_s11 = sphi %s1365_s11, %s1831_s11   ;;  %s1317_s10 = sphi %s1363_s10, %s1830_s10   ;;  %s1313_s9 = sphi %s1361_s9, %s1829_s9  }
   0x8   : > { %p51_p0 = scmp.ne.s32.totalorder %s1317_s10, %s1313_s9  ;;  %p1395_p1 = scmp.eq.s32.totalorder %s737_s15, 0 }
   0x9   : > { %p1399_p2 = scmp.eq.s32.totalorder %s737_s15, 1  ;;  %p107_p3 = scmp.eq.s32.totalorder %s738_s16, 1 }
   0xa   : > { %s1806_s17 = scalar_select %p1395_p1, 1, 0 }
   0xb   : > { %s1807_s18 = scalar_select %p1399_p2, 1, 0 }
   0xc   : > { %p1405_p4 = por %p1395_p1, %p51_p0  ;;  %p739_p5 = scmp.ge.s32.totalorder %s1333_s14, 1 }
   0xd   : > { %p1410_p6 = por %p107_p3, %p51_p0  ;;  %p114_p7 = scmp.lt.s32.totalorder %s1333_s14, 3 }
   0xe   : > { %s1808_s19 = scalar_select %p1405_p4, 1, 0 }
   0xf   : > { %s1809_s20 = scalar_select %p1410_p6, 1, 0 }
  0x10   : > { %p1415_p8 = pnand %p739_p5, %p114_p7  ;;  %s1335_s22 = smov [#allocation5]  }
  0x11   : > { %s128_s23 = sshll.u32 %s1335_s22, 4  ;;  %s31_s25 = sadd.s32 1, %s1329_s13  ;;  %s129_s23 = int_to_ptr.vmem [resolvable:$true] %s128_s23 }
  0x12   : > { %s1810_s21 = scalar_select %p1415_p8, 1, 0 }
  0x13   : > { %p1116_p9 = pneg %p1415_p8  ;;  %s1189_s28 = scalar_lea.hbm %s1800_s1, 768 }
  0x14   : > { %p1190_p12 = scmp.ne.s32.totalorder %s1800_s1, %s1189_s28  ;;  %p1196_p5 = scmp.lt.u32.totalorder %s1189_s28, %s1800_s1 }
  0x15   : > { %p1424_p11 = pnand %p1116_p9, %p1395_p1 }
  0x17   : > { %p1191_p13 = pneg %p1424_p11 }
  0x19   : > { %p1192_p0 = pnand %p1191_p13, %p1190_p12 }
  0x1b   : > { %p1193_p3 = pneg %p1192_p0 }
  0x1d   : > { %p1198_p7 = pnand %p1196_p5, %p1193_p3 }
  0x1f   : > { %1201 = shalt.err (!%p1198_p7)
}
  0x20   : > { %s1202_s5 = scalar_lea.vmem %s129_s23, 768  ;;  %p1210_p1 = scmp.lt.s32.totalorder %s129_s23, %s129_s23 }
  0x21   : > { %p1203_p9 = scmp.ne.s32.totalorder %s129_s23, %s1202_s5  ;;  %p1211_p4 = scmp.lt.s32.totalorder %s1202_s5, %s1202_s5 }
  0x23   : > { %p1205_p10 = pnand %p1203_p9, %p1191_p13  ;;  %p1212_p8 = por %p1211_p4, %p1210_p1 }
  0x25   : > { %p1206_p6 = pneg %p1205_p10 }
  0x27   : > { %p1213_p2 = pnand %p1212_p8, %p1206_p6 }
  0x29   : > { %1216 = shalt.err (!%p1213_p2)
}
  0x2a   : > { %s1336_s6 = smov 128   ;;  %s1337_s7 = smov 8  }
  0x2b   : > { %1119 = dma.hbm_to_vmem [thread:$0]  (!%p1424_p11), %s1800_s1, 768, %s129_s23, [#allocation6], %s1336_s6, %s1336_s6, %s1337_s7  }
  0x2c   : > { %p33_p1 = scmp.ge.s32.totalorder %s31_s25, 2  ;;  %s38_s16 = sadd.s32 1, %s1321_s11 }
  0x2d   : > { %p45_p2 = scmp.ne.s32.totalorder %s1321_s11, %s1317_s10  ;;  %p46_p4 = scmp.eq.s32.totalorder %s1333_s14, 0 }
  0x2e   : > { %s1835_s25 = smov (%p33_p1, %s31_s25), 0  ;;  %p1813_p8 = scmp.ne.s32.totalorder %s1807_s18, 0 }
  0x2f   : > { %p1451_p6 = por %p46_p4, %p45_p2  ;;  %s35_s24 = ssub.s32 %s1329_s13, %s1835_s25 }
  0x30   : > { %p1457_p10 = por %p1813_p8, %p45_p2  ;;  %p1129_p12 = scmp.lt.s32.totalorder %s1333_s14, 2 }
  0x31   : > { %p36_p11 = scmp.eq.s32.totalorder %s35_s24, 0  ;;  %s142_s23 = sand.u32 1, %s1321_s11  }
  0x32   : > { %s742_s27 = sshll.u32 %s142_s23, 2  ;;  %s743_s29 = sshll.u32 %s1329_s13, 6 }
  0x33   : > { %s1466_s28 = scalar_select %p36_p11, %s1321_s11, %s38_s16  }
  0x34   : > { %s1472_s4 = scalar_lea.hbm %s1799_s0, %s743_s29  ;;  %s146_s18 = scalar_lea.vmem [#allocation2], %s742_s27 }
  0x35   : > { %s153_s5 = sshll.u32 %s146_s18, 4  ;;  %p1478_p13 = pnand %p1129_p12, %p1451_p6  ;;  %s1474_s5 = int_to_ptr.vmem [resolvable:$true] %s153_s5 }
  0x36   : > { %s143_s7 = scalar_lea.sflag [#allocation3], %s142_s23  ;;  %s1217_s8 = scalar_lea.hbm %s1472_s4, 64 }
  0x37   : > { %p1218_p0 = scmp.ne.s32.totalorder %s1472_s4, %s1217_s8  ;;  %p1219_p3 = pneg %p1478_p13 }
  0x38   : > { %s1222_s24 = scalar_lea.hbm %s1799_s0, 128  ;;  %p1223_p9 = scmp.lt.u32.totalorder %s1472_s4, %s1799_s0 }
  0x39   : > { %p1220_p5 = pnand %p1219_p3, %p1218_p0  ;;  %p1224_p1 = scmp.lt.u32.totalorder %s1222_s24, %s1217_s8 }
  0x3a   : > { %p1226_p4 = scmp.lt.u32.totalorder %s1217_s8, %s1472_s4 }
  0x3b   : > { %p1221_p7 = pneg %p1220_p5  ;;  %p1225_p2 = por %p1224_p1, %p1223_p9 }
  0x3d   : > { %p1227_p6 = por %p1226_p4, %p1225_p2 }
  0x3f   : > { %p1228_p8 = pnand %p1227_p6, %p1221_p7 }
  0x41   : > { %1231 = shalt.err (!%p1228_p8)
}
  0x42   : > { %s1232_s23 = scalar_lea.vmem %s1474_s5, 64  ;;  %s1338_s29 = smov [#allocation2]  }
  0x43   : > { %p1233_p12 = scmp.ne.s32.totalorder %s1474_s5, %s1232_s23  ;;  %s1237_s30 = sshll.u32 %s1338_s29, 4  ;;  %s1238_s30 = int_to_ptr.vmem [resolvable:$false] %s1237_s30 }
  0x44   : > { %s1239_s3 = scalar_lea.vmem %s1238_s30, 128  ;;  %p1240_p5 = scmp.lt.s32.totalorder %s1474_s5, %s1238_s30 }
  0x45   : > { %p1235_p11 = pnand %p1233_p12, %p1219_p3  ;;  %p1241_p9 = scmp.lt.s32.totalorder %s1239_s3, %s1232_s23 }
  0x47   : > { %p1236_p0 = pneg %p1235_p11  ;;  %p1242_p1 = por %p1241_p9, %p1240_p5 }
  0x49   : > { %p1243_p2 = pnand %p1242_p1, %p1236_p0 }
  0x4b   : > { %1246 = shalt.err (!%p1243_p2)
}
  0x4c   : > { %1123 = dma.hbm_to_vmem [thread:$0]  (!%p1478_p13), %s1472_s4, 64, %s1474_s5, %s143_s7  }
  0x4d   : > { %p1816_p7 = scmp.ne.s32.totalorder %s1810_s21, 0 }
  0x4e   : > { %s1510_s18 = sand.u32 (!%p1816_p7), 1, %s1317_s10   ;;  %p1817_p3 = scmp.ne.s32.totalorder (!%p1816_p7), %s1808_s19, 0 }
  0x4f   : > { %162 = sbr.rel (%p1816_p7) target bundleno = 636 (0x27c), region = 28  ;;  %s745_s8 = sshll.u32 (!%p1816_p7), %s1510_s18, 2 }
  0x50   : > { %s165_s15 = scalar_lea.sflag (!%p1816_p7), [#allocation3], %s1510_s18  ;;  %s168_s16 = scalar_lea.vmem (!%p1816_p7), [#allocation2], %s745_s8 }
  0x56   : > { %1300 = dma.done.wait (%p1817_p3), %s165_s15, 64  }
  0x57   : > { %1302 = vsyncadd (%p1817_p3), %s165_s15, 4294967232  ;;  %p1818_p4 = scmp.ne.s32.totalorder %s1806_s17, 0 }
  0x59   : > { %1304 = dma.done.wait (%p1818_p4), [#allocation6], 768  }
  0x5a   : > { %1306 = vsyncadd (%p1818_p4), [#allocation6], 4294966528  ;;  %s747_s21 = sshll.u32 %s1510_s18, 4  ;;  %s1524_s4 = sshll.u32 %s1325_s12, 7  ;;  %v204_v0 = vlaneseq  ;;  %v1339_v1 = vmov 0.0  }
  0x5b   : > { %s1526_s5 = scalar_lea.vmem [#allocation7], %s747_s21  ;;  %v1568_v15 = vld [vmem:[%s168_s16] sm:$0x7]  ;;  %p749_p13 = scmp.ge.s32.totalorder %s1524_s4, 42 }
  0x5c   : > { %197 = vst [vmem:[%s1526_s5] sm:$0xff] %v1339_v1  ;;  %198 = vst [vmem:[%s1526_s5 + $0x8] sm:$0xff] %v1339_v1  ;;  %v1530_v2 = vshrl.u32 %v204_v0, 7  ;;  %v279_v20 = vld [vmem:[#allocation5] sm:$0xff] (!%p749_p13)  ;;  %v1340_v22 = vmov (!%p749_p13), 1.0|1.0   ;;  %v280_v23 = vld [vmem:[#allocation5 + $0x8] sm:$0xff] (!%p749_p13) }
  0x5d   : > { %224 = sbr.rel (%p749_p13) target bundleno = 351 (0x15f), region = 44  ;;  %937 = vmatprep.mubr.f32.mxu0 (!%p749_p13), %v279_v20 }
  0x5e   : > { %v1533_v3 = vadd.s32 8, %v1530_v2  ;;  %v1536_v4 = vadd.s32 16, %v1530_v2  ;;  %v1539_v5 = vadd.s32 24, %v1530_v2  ;;  %v1542_v6 = vadd.s32 32, %v1530_v2 }
  0x5f   : > { %v1545_v7 = vadd.s32 40, %v1530_v2  ;;  %v1548_v8 = vadd.s32 48, %v1530_v2  ;;  %v1551_v9 = vadd.s32 56, %v1530_v2  ;;  %v1554_v10 = vadd.s32 64, %v1530_v2 }
  0x60   : > { %v1557_v11 = vadd.s32 72, %v1530_v2  ;;  %v1560_v12 = vadd.s32 80, %v1530_v2  ;;  %v1563_v13 = vadd.s32 88, %v1530_v2  ;;  %v1566_v14 = vadd.s32 96, %v1530_v2 }
  0x61   : > { %v1571_v16 = vadd.s32 104, %v1530_v2  ;;  %v1574_v17 = vadd.s32 112, %v1530_v2  ;;  %v1577_v18 = vadd.s32 120, %v1530_v2  ;;  %v227_v19 = vsub.s32 (!%p749_p13), 0, %v1530_v2 }
  0x63   : > { %v228_v21 = vrot.slane (!%p749_p13), %v1568_v15, %v227_v19  ;;  %v278_v24 = vld [vmem:[%s1526_s5 + $0x8] sm:$0xff] (!%p749_p13)  ;;  %v277_v25 = vld [vmem:[%s1526_s5] sm:$0xff] (!%p749_p13) }
  0x65   : > { %vm229_vm0 = vcmp.eq.s32.totalorder %v1530_v2, %v228_v21  ;;  %vm230_vm1 = vcmp.eq.s32.totalorder %v1533_v3, %v228_v21  ;;  %vm231_vm2 = vcmp.eq.s32.totalorder %v1536_v4, %v228_v21  ;;  %vm232_vm3 = vcmp.eq.s32.totalorder %v1539_v5, %v228_v21 }
  0x66   : > { %vm1010_vm4 = vmpackc.low %vm230_vm1, %vm229_vm0  ;;  %vm233_vm6 = vcmp.eq.s32.totalorder %v1542_v6, %v228_v21  ;;  %vm234_vm7 = vcmp.eq.s32.totalorder %v1545_v7, %v228_v21  ;;  %vm235_vm9 = vcmp.eq.s32.totalorder %v1548_v8, %v228_v21  ;;  %vm236_vm10 = vcmp.eq.s32.totalorder %v1551_v9, %v228_v21 }
  0x67   : > { %1011 = vmatprep.subr.msk.bf16.mxu0 %vm1010_vm4, %v1340_v22  ;;  %vm1014_vm5 = vmpackc.low %vm232_vm3, %vm231_vm2  ;;  %vm237_vm12 = vcmp.eq.s32.totalorder %v1554_v10, %v228_v21  ;;  %vm238_vm13 = vcmp.eq.s32.totalorder %v1557_v11, %v228_v21  ;;  %vm239_vm15 = vcmp.eq.s32.totalorder %v1560_v12, %v228_v21  ;;  %vm240_vm0 = vcmp.eq.s32.totalorder %v1563_v13, %v228_v21 }
  0x68   : > { %1013 = vmatpush3.bf16.msk.msra.mxu0 %vm1010_vm4, %v1340_v22  ;;  %vm1018_vm8 = vmpackc.low %vm234_vm7, %vm233_vm6  ;;  %vm241_vm2 = vcmp.eq.s32.totalorder %v1566_v14, %v228_v21  ;;  %vm242_vm3 = vcmp.eq.s32.totalorder %v1571_v16, %v228_v21  ;;  %vm244_vm6 = vcmp.eq.s32.totalorder %v1577_v18, %v228_v21 }
  0x69   : > { %1015 = vmatprep.subr.msk.bf16.mxu0 %vm1014_vm5, %v1340_v22  ;;  %vm1022_vm11 = vmpackc.low %vm236_vm10, %vm235_vm9 }
  0x6a   : > { %vm1026_vm14 = vmpackc.low %vm238_vm13, %vm237_vm12 }
  0x6b   : > { %vm1030_vm1 = vmpackc.low %vm240_vm0, %vm239_vm15 }
  0x6c   : > { %1017 = vmatpush3.bf16.msk.msra.mxu0 %vm1014_vm5, %v1340_v22  ;;  %vm1034_vm4 = vmpackc.low %vm242_vm3, %vm241_vm2  ;;  %vm243_vm5 = vcmp.eq.s32.totalorder %v1574_v17, %v228_v21 }
  0x6d   : > { %1019 = vmatprep.subr.msk.bf16.mxu0 %vm1018_vm8, %v1340_v22  ;;  %vm1038_vm7 = vmpackc.low %vm244_vm6, %vm243_vm5 }
  0x70   : > { %1021 = vmatpush3.bf16.msk.msra.mxu0 %vm1018_vm8, %v1340_v22 }
  0x71   : > { %1023 = vmatprep.subr.msk.bf16.mxu0 %vm1022_vm11, %v1340_v22 }
  0x74   : > { %1025 = vmatpush3.bf16.msk.msra.mxu0 %vm1022_vm11, %v1340_v22 }
  0x75   : > { %1027 = vmatprep.subr.msk.bf16.mxu0 %vm1026_vm14, %v1340_v22 }
  0x78   : > { %1029 = vmatpush3.bf16.msk.msra.mxu0 %vm1026_vm14, %v1340_v22 }
  0x79   : > { %1031 = vmatprep.subr.msk.bf16.mxu0 %vm1030_vm1, %v1340_v22 }
  0x7c   : > { %1033 = vmatpush3.bf16.msk.msra.mxu0 %vm1030_vm1, %v1340_v22 }
  0x7d   : > { %1035 = vmatprep.subr.msk.bf16.mxu0 %vm1034_vm4, %v1340_v22 }
  0x80   : > { %1037 = vmatpush3.bf16.msk.msra.mxu0 %vm1034_vm4, %v1340_v22 }
  0x81   : > { %1039 = vmatprep.subr.msk.bf16.mxu0 %vm1038_vm7, %v1340_v22 }
  0x84   : > { %1041 = vmatpush3.bf16.msk.msra.mxu0 %vm1038_vm7, %v1340_v22 }
  0x87   : > { %938 = vmatmul.mubr.f32.vlgmr.msra.gmra.mrb[0].mxu0 %v280_v23 }
 0x15a   : > { %v939_v26 = vpop.f32.mrb[0].mxu0 }
 0x15b   : > { %v357_v27 = vadd.f32 %v939_v26, %v278_v24  ;;  %v347_v28 = vpop.f32.mrb[1].mxu0 }
 0x15c   : > { %v356_v29 = vadd.f32 %v347_v28, %v277_v25 }
 0x15d   : > { %359 = vst [vmem:[%s1526_s5 + $0x8] sm:$0xff] %v357_v27 }
 0x15e   : > { %358 = vst [vmem:[%s1526_s5] sm:$0xff] %v356_v29 }
 0x15f PF: > { %s360_s12 = sadd.s32 128, %s1524_s4 }
 0x160   : > { %p782_p6 = scmp.le.s32.totalorder %s360_s12, 42 }
 0x161   : > { %v419_v30 = vsub.s32 (!%p782_p6), 2, %v1530_v2  ;;  %v367_v31 = vsub.s32 (!%p782_p6), 1, %v1530_v2  ;;  %v475_v32 = vld [vmem:[#allocation5 + $0x20] sm:$0xff] (!%p782_p6)  ;;  %v472_v33 = vld [vmem:[#allocation5 + $0x10] sm:$0xff] (!%p782_p6)  ;;  %v1341_v36 = vmov (!%p782_p6), 1.0|1.0  }
 0x162   : > { %364 = sbr.rel (%p782_p6) target bundleno = 610 (0x262), region = 48  ;;  %972 = vmatprep.mubr.f32.mxu1 (!%p782_p6), %v475_v32  ;;  %1007 = vmatprep.mubr.f32.mxu0 (!%p782_p6), %v472_v33  ;;  %v476_v41 = vld [vmem:[#allocation5 + $0x28] sm:$0xff] (!%p782_p6)  ;;  %v473_v42 = vld [vmem:[#allocation5 + $0x18] sm:$0xff] (!%p782_p6) }
 0x163   : > { %v1606_v34 = vrot.slane (!%p782_p6), %v1568_v15, %v419_v30  ;;  %v1609_v35 = vrot.slane (!%p782_p6), %v1568_v15, %v367_v31 }
 0x164   : > { %v470_v44 = vld [vmem:[%s1526_s5 + $0x8] sm:$0xff] (!%p782_p6) }
 0x165   : > { %vm421_vm8 = vcmp.eq.s32.totalorder (!%p782_p6), %v1530_v2, %v1606_v34  ;;  %vm422_vm9 = vcmp.eq.s32.totalorder (!%p782_p6), %v1533_v3, %v1606_v34  ;;  %vm369_vm10 = vcmp.eq.s32.totalorder (!%p782_p6), %v1530_v2, %v1609_v35  ;;  %vm370_vm11 = vcmp.eq.s32.totalorder (!%p782_p6), %v1533_v3, %v1609_v35  ;;  %v469_v48 = vld [vmem:[%s1526_s5] sm:$0xff] (!%p782_p6) }
 0x166   : > { %vm1042_vm12 = vmpackc.low (!%p782_p6), %vm422_vm9, %vm421_vm8  ;;  %vm423_vm13 = vcmp.eq.s32.totalorder (!%p782_p6), %v1536_v4, %v1606_v34  ;;  %vm424_vm14 = vcmp.eq.s32.totalorder (!%p782_p6), %v1539_v5, %v1606_v34  ;;  %vm371_vm15 = vcmp.eq.s32.totalorder (!%p782_p6), %v1536_v4, %v1609_v35  ;;  %vm372_vm0 = vcmp.eq.s32.totalorder (!%p782_p6), %v1539_v5, %v1609_v35 }
 0x167   : > { %1043 = vmatprep.subr.msk.bf16.mxu1 (!%p782_p6), %vm1042_vm12, %v1341_v36  ;;  %vm1074_vm1 = vmpackc.low (!%p782_p6), %vm370_vm11, %vm369_vm10  ;;  %vm425_vm2 = vcmp.eq.s32.totalorder (!%p782_p6), %v1542_v6, %v1606_v34  ;;  %vm426_vm3 = vcmp.eq.s32.totalorder (!%p782_p6), %v1545_v7, %v1606_v34  ;;  %vm373_vm5 = vcmp.eq.s32.totalorder (!%p782_p6), %v1542_v6, %v1609_v35  ;;  %vm374_vm6 = vcmp.eq.s32.totalorder (!%p782_p6), %v1545_v7, %v1609_v35 }
 0x168   : > { %1075 = vmatprep.subr.msk.bf16.mxu0 (!%p782_p6), %vm1074_vm1, %v1341_v36  ;;  %1045 = vmatpush3.bf16.msk.msra.mxu1 (!%p782_p6), %vm1042_vm12, %v1341_v36  ;;  %vm1046_vm4 = vmpackc.low (!%p782_p6), %vm424_vm14, %vm423_vm13  ;;  %vm427_vm10 = vcmp.eq.s32.totalorder (!%p782_p6), %v1548_v8, %v1606_v34  ;;  %vm428_vm11 = vcmp.eq.s32.totalorder (!%p782_p6), %v1551_v9, %v1606_v34  ;;  %vm375_vm12 = vcmp.eq.s32.totalorder (!%p782_p6), %v1548_v8, %v1609_v35 }
 0x169   : > { %1077 = vmatpush3.bf16.msk.msra.mxu0 %vm1074_vm1, %v1341_v36  ;;  %1047 = vmatprep.subr.msk.bf16.mxu1 %vm1046_vm4, %v1341_v36  ;;  %vm1078_vm7 = vmpackc.low %vm372_vm0, %vm371_vm15  ;;  %vm376_vm13 = vcmp.eq.s32.totalorder %v1551_v9, %v1609_v35  ;;  %vm429_vm0 = vcmp.eq.s32.totalorder %v1554_v10, %v1606_v34  ;;  %vm430_vm1 = vcmp.eq.s32.totalorder %v1557_v11, %v1606_v34 }
 0x16a   : > { %1079 = vmatprep.subr.msk.bf16.mxu0 %vm1078_vm7, %v1341_v36  ;;  %vm1050_vm8 = vmpackc.low %vm426_vm3, %vm425_vm2  ;;  %vm377_vm2 = vcmp.eq.s32.totalorder %v1554_v10, %v1609_v35  ;;  %vm378_vm3 = vcmp.eq.s32.totalorder %v1557_v11, %v1609_v35 }
 0x16b   : > { %vm1641_vm9 = vmpackc.low %vm374_vm6, %vm373_vm5  ;;  %vm431_vm6 = vcmp.eq.s32.totalorder %v1560_v12, %v1606_v34 }
 0x16c   : > { %1049 = vmatpush3.bf16.msk.msra.mxu1 %vm1046_vm4, %v1341_v36  ;;  %vm1054_vm14 = vmpackc.low %vm428_vm11, %vm427_vm10 }
 0x16d   : > { %1081 = vmatpush3.bf16.msk.msra.mxu0 %vm1078_vm7, %v1341_v36  ;;  %1051 = vmatprep.subr.msk.bf16.mxu1 %vm1050_vm8, %v1341_v36  ;;  %vm1659_vm15 = vmpackc.low %vm376_vm13, %vm375_vm12  ;;  %vm432_vm7 = vcmp.eq.s32.totalorder %v1563_v13, %v1606_v34  ;;  %vm433_vm12 = vcmp.eq.s32.totalorder %v1566_v14, %v1606_v34  ;;  %vm434_vm13 = vcmp.eq.s32.totalorder %v1571_v16, %v1606_v34 }
 0x16e   : > { %1083 = vmatprep.subr.msk.bf16.mxu0 %vm1641_vm9, %v1341_v36  ;;  %vm1058_vm4 = vmpackc.low %vm430_vm1, %vm429_vm0 }
 0x16f   : > { %vm1679_vm5 = vmpackc.low %vm378_vm3, %vm377_vm2  ;;  %vm435_vm2 = vcmp.eq.s32.totalorder %v1574_v17, %v1606_v34  ;;  %vm436_vm3 = vcmp.eq.s32.totalorder %v1577_v18, %v1606_v34 }
 0x170   : > { %1053 = vmatpush3.bf16.msk.msra.mxu1 %vm1050_vm8, %v1341_v36  ;;  %vm379_vm8 = vcmp.eq.s32.totalorder %v1560_v12, %v1609_v35  ;;  %vm1062_vm10 = vmpackc.low %vm432_vm7, %vm431_vm6 }
 0x171   : > { %1085 = vmatpush3.bf16.msk.msra.mxu0 %vm1641_vm9, %v1341_v36  ;;  %1055 = vmatprep.subr.msk.bf16.mxu1 %vm1054_vm14, %v1341_v36  ;;  %vm380_vm9 = vcmp.eq.s32.totalorder %v1563_v13, %v1609_v35  ;;  %vm1066_vm0 = vmpackc.low %vm434_vm13, %vm433_vm12 }
 0x172   : > { %1087 = vmatprep.subr.msk.bf16.mxu0 %vm1659_vm15, %v1341_v36  ;;  %vm1699_vm11 = vmpackc.low %vm380_vm9, %vm379_vm8 }
 0x173   : > { %vm1070_vm6 = vmpackc.low %vm436_vm3, %vm435_vm2 }
 0x174   : > { %1057 = vmatpush3.bf16.msk.msra.mxu1 %vm1054_vm14, %v1341_v36  ;;  %vm381_vm14 = vcmp.eq.s32.totalorder %v1566_v14, %v1609_v35 }
 0x175   : > { %1089 = vmatpush3.bf16.msk.msra.mxu0 %vm1659_vm15, %v1341_v36  ;;  %1059 = vmatprep.subr.msk.bf16.mxu1 %vm1058_vm4, %v1341_v36  ;;  %vm382_vm15 = vcmp.eq.s32.totalorder %v1571_v16, %v1609_v35 }
 0x176   : > { %1091 = vmatprep.subr.msk.bf16.mxu0 %vm1679_vm5, %v1341_v36  ;;  %vm1098_vm1 = vmpackc.low %vm382_vm15, %vm381_vm14 }
 0x178   : > { %1061 = vmatpush3.bf16.msk.msra.mxu1 %vm1058_vm4, %v1341_v36  ;;  %vm383_vm4 = vcmp.eq.s32.totalorder %v1574_v17, %v1609_v35 }
 0x179   : > { %1093 = vmatpush3.bf16.msk.msra.mxu0 %vm1679_vm5, %v1341_v36  ;;  %1063 = vmatprep.subr.msk.bf16.mxu1 %vm1062_vm10, %v1341_v36  ;;  %vm384_vm5 = vcmp.eq.s32.totalorder %v1577_v18, %v1609_v35 }
 0x17a   : > { %1095 = vmatprep.subr.msk.bf16.mxu0 %vm1699_vm11, %v1341_v36  ;;  %vm1102_vm7 = vmpackc.low %vm384_vm5, %vm383_vm4 }
 0x17c   : > { %1065 = vmatpush3.bf16.msk.msra.mxu1 %vm1062_vm10, %v1341_v36 }
 0x17d   : > { %1097 = vmatpush3.bf16.msk.msra.mxu0 %vm1699_vm11, %v1341_v36  ;;  %1067 = vmatprep.subr.msk.bf16.mxu1 %vm1066_vm0, %v1341_v36 }
 0x17e   : > { %1099 = vmatprep.subr.msk.bf16.mxu0 %vm1098_vm1, %v1341_v36 }
 0x180   : > { %1069 = vmatpush3.bf16.msk.msra.mxu1 %vm1066_vm0, %v1341_v36 }
 0x181   : > { %1101 = vmatpush3.bf16.msk.msra.mxu0 %vm1098_vm1, %v1341_v36  ;;  %1071 = vmatprep.subr.msk.bf16.mxu1 %vm1070_vm6, %v1341_v36 }
 0x182   : > { %1103 = vmatprep.subr.msk.bf16.mxu0 %vm1102_vm7, %v1341_v36 }
 0x184   : > { %1073 = vmatpush3.bf16.msk.msra.mxu1 %vm1070_vm6, %v1341_v36 }
 0x185   : > { %1105 = vmatpush3.bf16.msk.msra.mxu0 %vm1102_vm7, %v1341_v36 }
 0x187   : > { %973 = vmatmul.mubr.f32.vlgmr.msra.gmra.mrb[0].mxu1 %v476_v41 }
 0x188   : > { %1008 = vmatmul.mubr.f32.vlgmr.msra.gmra.mrb[0].mxu0 %v473_v42 }
 0x25a   : > { %v974_v43 = vpop.f32.mrb[0].mxu1 }
 0x25b   : > { %v1009_v45 = vpop.f32.mrb[0].mxu0  ;;  %v543_v46 = vpop.f32.mrb[1].mxu1 }
 0x25c   : > { %v624_v47 = vadd.f32 %v1009_v45, %v974_v43  ;;  %v618_v49 = vpop.f32.mrb[1].mxu0 }
 0x25d   : > { %v619_v50 = vadd.f32 %v618_v49, %v543_v46 }
 0x25e   : > { %v628_v51 = vadd.f32 %v624_v47, %v470_v44 }
 0x25f   : > { %v627_v52 = vadd.f32 %v619_v50, %v469_v48 }
 0x260   : > { %630 = vst [vmem:[%s1526_s5 + $0x8] sm:$0xff] %v628_v51 }
 0x261   : > { %629 = vst [vmem:[%s1526_s5] sm:$0xff] %v627_v52 }
 0x262 PF: > { %s1747_s6 = scalar_lea.hbm %s1801_s2, %s1524_s4  ;;  %s644_s7 = sshll.u32 %s1526_s5, 4  ;;  %s1750_s7 = int_to_ptr.vmem [resolvable:$true] %s644_s7 }
 0x263   : > { %s632_s24 = scalar_lea.sflag [#allocation4], %s1510_s18  ;;  %s1247_s22 = scalar_lea.vmem %s1750_s7, 256 }
 0x264   : > { %p1248_p8 = scmp.ne.s32.totalorder %s1750_s7, %s1247_s22  ;;  %s1342_s27 = smov [#allocation7]  }
 0x265   : > { %s1251_s23 = sshll.u32 %s1342_s27, 4  ;;  %s1252_s23 = int_to_ptr.vmem [resolvable:$false] %s1251_s23 }
 0x266   : > { %p1249_p12 = pnand %p1248_p8, %p1457_p10  ;;  %s1253_s29 = scalar_lea.vmem %s1252_s23, 512 }
 0x267   : > { %p1254_p0 = scmp.lt.s32.totalorder %s1750_s7, %s1252_s23  ;;  %p1255_p5 = scmp.lt.s32.totalorder %s1253_s29, %s1247_s22 }
 0x268   : > { %p1250_p11 = pneg %p1249_p12 }
 0x269   : > { %p1256_p9 = por %p1255_p5, %p1254_p0 }
 0x26b   : > { %p1257_p1 = pnand %p1256_p9, %p1250_p11 }
 0x26d   : > { %1260 = shalt.err (!%p1257_p1)
}
 0x26e   : > { %s1261_s30 = scalar_lea.hbm %s1747_s6, 256  ;;  %s1265_s15 = scalar_lea.hbm %s1801_s2, 512 }
 0x26f   : > { %p1262_p2 = scmp.ne.s32.totalorder %s1747_s6, %s1261_s30  ;;  %p1266_p4 = scmp.lt.u32.totalorder %s1747_s6, %s1801_s2 }
 0x270   : > { %p1267_p13 = scmp.lt.u32.totalorder %s1265_s15, %s1261_s30  ;;  %p1269_p8 = scmp.lt.u32.totalorder %s1261_s30, %s1747_s6 }
 0x271   : > { %p1263_p7 = pnand %p1262_p2, %p1457_p10 }
 0x272   : > { %p1268_p6 = por %p1267_p13, %p1266_p4 }
 0x273   : > { %p1264_p3 = pneg %p1263_p7 }
 0x274   : > { %p1270_p12 = por %p1269_p8, %p1268_p6 }
 0x276   : > { %p1271_p11 = pnand %p1270_p12, %p1264_p3 }
 0x278   : > { %1274 = shalt.err (!%p1271_p11)
}
 0x279   : > { %s1343_s4 = smov 128   ;;  %s1344_s5 = smov 256  }
 0x27a   : > { %s1345_s12 = smov 8  }
 0x27b   : > { %1114 = dma.vmem_to_hbm [thread:$0]  (%p1457_p10), %s1750_s7, 256, %s1747_s6, %s632_s24, %s1343_s4, %s1344_s5, %s1345_s12  }
 0x27c PF: > { %s659_s17 = sand.u32 1, %s1313_s9   ;;  %p1827_p0 = scmp.ne.s32.totalorder %s1809_s20, 0 }
 0x27d   : > { %p1828_p5 = scmp.ge.s32.totalorder %s1333_s14, 2  ;;  %s660_s19 = scalar_lea.sflag [#allocation4], %s659_s17 }
 0x27f   : > { %p1125_p9 = pnand %p1828_p5, %p1827_p0 }
 0x281   : > { %1308 = dma.done.wait (!%p1125_p9), %s660_s19, 256  }
 0x282   : > { %1310 = vsyncadd (!%p1125_p9), %s660_s19, 4294967040  ;;  %s19_s14 = sadd.s32 1, %s1333_s14   ;;  %s1829_s9 = smov %s1317_s10 }
 0x283   : > { %p16_p1 = scmp.ge.s32.totalorder %s19_s14, 4   ;;  %s1830_s10 = smov %s1321_s11 }
 0x284   : > { %s1831_s11 = smov %s1466_s28  ;;  %s1832_s12 = smov %s1329_s13 }
 0x285   : > { %s1833_s13 = smov %s1835_s25  ;;  %18 = sbr.rel (!%p16_p1) target bundleno = 7 (0x7), region = 92 }
 0x28c   :  { %665 = vsyncpa [#allocation3], 1 }
 0x28d   :  { %667 = vsyncpa [#allocation3 + $0x1], 1 }
 0x28e   :  { %668 = vsyncpa [#allocation6], 1 }
 0x28f   :  { %669 = vsyncpa [#allocation4], 1 }
 0x290   :  { %671 = vsyncpa [#allocation4 + $0x1], 1 }

</bundles_post_ra>
